<compile_context>
chip_gen: v5e
topology: v5e:2x2
jax: 0.10.0
libtpu: 0.0.40
codegen_flags: <defaults>
</compile_context>

<pallas_src>
import functools

import jax
import jax.numpy as jnp
from jax.experimental import pallas as pl
from jax.experimental.pallas import tpu as pltpu

EPS = 1e-5
_VMEM_LIMIT = 32 * 1024 * 1024       # explicit scoped-VMEM budget (all gens)
_MAX_TILE_BYTES = 2 * 1024 * 1024    # per (C, T) f32 tile; keeps double-
                                     # buffered in+out tiles << _VMEM_LIMIT


def _pick_lane_tile(hw, c):
    """Largest multiple-of-128 divisor of `hw` whose (c, T) f32 tile fits the
    per-tile byte budget; falls back to the full extent (always legal)."""
    if hw % 128 != 0:
        return hw
    best = 128
    t = 128
    while t <= hw:
        if hw % t == 0 and c * t * 4 <= _MAX_TILE_BYTES:
            best = t
        t += 128
    return best


# ----------------------------- kernels ------------------------------------ #
def _stats_kernel(x_ref, mean_ref, var_ref, mean_acc, m2_acc, *,
                  n_per_tile, n_total):
    """Per-channel mean / biased variance of one deep-supervision half.

    Grid = (half_idx, batch_row, hw_tile); the last two axes are the
    reduction.  Per-tile stats are merged into f32 scratch with Chan/Welford
    updates (equal tile counts -> merge weight 1/(step+1)), avoiding the
    E[x^2] - mean^2 cancellation problem.
    """
    b = pl.program_id(1)
    t = pl.program_id(2)
    nb = pl.num_programs(1)
    nt = pl.num_programs(2)

    @pl.when(jnp.logical_and(b == 0, t == 0))
    def _init():
        mean_acc[...] = jnp.zeros_like(mean_acc)
        m2_acc[...] = jnp.zeros_like(m2_acc)

    x = x_ref[0].astype(jnp.float32)                        # (C, T) f32 accum
    tile_mean = jnp.sum(x, axis=-1, keepdims=True) * (1.0 / n_per_tile)
    xc = x - tile_mean
    tile_m2 = jnp.sum(xc * xc, axis=-1, keepdims=True)      # (C, 1)

    step = b * nt + t                                       # reduction step
    step_f = jnp.full(mean_acc.shape, step, jnp.int32).astype(jnp.float32)
    inv_cnt = 1.0 / (step_f + 1.0)                          # n_tile / n_so_far
    delta = tile_mean - mean_acc[...]
    mean_acc[...] = mean_acc[...] + delta * inv_cnt
    m2_acc[...] = (m2_acc[...] + tile_m2
                   + (delta * delta) * (n_per_tile * step_f * inv_cnt))

    @pl.when(jnp.logical_and(b == nb - 1, t == nt - 1))
    def _finalize():
        mean_ref[0] = mean_acc[...]
        var_ref[0] = m2_acc[...] * (1.0 / n_total)           # biased variance


def _affine_kernel(x_ref, scale_ref, shift_ref, o_ref):
    """y = x * scale + shift (per-channel FMA); f32 math, cast on store."""
    x = x_ref[0].astype(jnp.float32)                         # (C, T)
    o_ref[0] = (x * scale_ref[0] + shift_ref[0]).astype(o_ref.dtype)


# ----------------------------- wrappers ------------------------------------ #
def _normalize(x3, scale_b, shift_b, lane_tile):
    """Streaming per-channel affine over x3: (B, C, HW)."""
    B, C, hw = x3.shape
    nt = hw // lane_tile
    return pl.pallas_call(
        _affine_kernel,
        out_shape=jax.ShapeDtypeStruct((B, C, hw), x3.dtype),
        grid_spec=pltpu.PrefetchScalarGridSpec(
            num_scalar_prefetch=0,
            grid=(B, nt),
            in_specs=[
                pl.BlockSpec((1, C, lane_tile), lambda i, t: (i, 0, t)),
                pl.BlockSpec((1, C, 1), lambda i, t: (i, 0, 0)),
                pl.BlockSpec((1, C, 1), lambda i, t: (i, 0, 0)),
            ],
            out_specs=pl.BlockSpec((1, C, lane_tile), lambda i, t: (i, 0, t)),
        ),
        compiler_params=pltpu.CompilerParams(
            dimension_semantics=("parallel", "parallel"),
            vmem_limit_bytes=_VMEM_LIMIT),
    )(x3, scale_b, shift_b)


def sync_dsbn_train(x, gamma, beta, eps=EPS, statistics_batch=None,
                    lane_tile=None):
    """Training forward. x: (B, C, H, W) NCHW. gamma/beta: (2, C)."""
    B, C, H, W = x.shape
    if statistics_batch is None:
        assert B % 2 == 0, f"error batch size {B}"
        statistics_batch = B // 2
    half = statistics_batch
    # TODO(synk): unequal deep-supervision splits (statistics_batch != B//2)
    # would need a ragged reduction grid; only the default equal split here.
    assert 2 * half == B, "only the default equal split is supported"

    hw = H * W
    x3 = x.reshape(B, C, hw)                     # free reshape, no transpose
    T = lane_tile if lane_tile is not None else _pick_lane_tile(hw, C)
    assert hw % T == 0
    nt = hw // T

    mean, var = pl.pallas_call(
        functools.partial(_stats_kernel, n_per_tile=T, n_total=half * hw),
        out_shape=(jax.ShapeDtypeStruct((2, C, 1), jnp.float32),
                   jax.ShapeDtypeStruct((2, C, 1), jnp.float32)),
        grid_spec=pltpu.PrefetchScalarGridSpec(
            num_scalar_prefetch=0,
            grid=(2, half, nt),
            in_specs=[pl.BlockSpec((1, C, T),
                                   lambda h, b, t: (h * half + b, 0, t))],
            out_specs=(pl.BlockSpec((1, C, 1), lambda h, b, t: (h, 0, 0)),
                       pl.BlockSpec((1, C, 1), lambda h, b, t: (h, 0, 0))),
            scratch_shapes=[pltpu.VMEM((C, 1), jnp.float32),
                            pltpu.VMEM((C, 1), jnp.float32)]),
        compiler_params=pltpu.CompilerParams(
            dimension_semantics=("parallel", "arbitrary", "arbitrary"),
            vmem_limit_bytes=_VMEM_LIMIT),
    )(x3)

    mean = mean[..., 0]                               # (2, C) float32
    var = var[..., 0]
    inv = 1.0 / jnp.sqrt(var + eps)
    scale = gamma.astype(jnp.float32) * inv           # fold affine into 1 FMA
    shift = beta.astype(jnp.float32) - mean * scale
    scale_b = jnp.repeat(scale, half, axis=0).reshape(B, C, 1)
    shift_b = jnp.repeat(shift, half, axis=0).reshape(B, C, 1)

    out3 = _normalize(x3, scale_b, shift_b, T)
    return out3.reshape(B, C, H, W)


def sync_dsbn_eval(x, gamma1, beta1, running_mean1, running_var1, eps=EPS,
                   lane_tile=None):
    """Eval forward: whole input through dsbn1's running stats."""
    B, C, H, W = x.shape
    hw = H * W
    x3 = x.reshape(B, C, hw)
    T = lane_tile if lane_tile is not None else _pick_lane_tile(hw, C)
    assert hw % T == 0

    inv = 1.0 / jnp.sqrt(running_var1.astype(jnp.float32) + eps)
    scale = gamma1.astype(jnp.float32) * inv
    shift = (beta1.astype(jnp.float32)
             - running_mean1.astype(jnp.float32) * scale)
    scale_b = jnp.broadcast_to(scale.reshape(1, C, 1), (B, C, 1))
    shift_b = jnp.broadcast_to(shift.reshape(1, C, 1), (B, C, 1))

    out3 = _normalize(x3, scale_b, shift_b, T)
    return out3.reshape(B, C, H, W)


# ----------------------------- reference ----------------------------------- #
def _ref_train(x, gamma, beta, eps=EPS):
    B = x.shape[0]
    half = B // 2
    outs = []
    for idx, xh in enumerate([x[:half], x[half:]]):
        m = xh.mean(axis=(0, 2, 3), keepdims=True)
        v = ((xh - m) ** 2).mean(axis=(0, 2, 3), keepdims=True)
        g = gamma[idx].reshape(1, -1, 1, 1)
        b = beta[idx].reshape(1, -1, 1, 1)
        outs.append(g * (xh - m) / jnp.sqrt(v + eps) + b)
    return jnp.concatenate(outs, axis=0)


def _ref_eval(x, g, b, rm, rv, eps=EPS):
    g = g.reshape(1, -1, 1, 1)
    b = b.reshape(1, -1, 1, 1)
    rm = rm.reshape(1, -1, 1, 1)
    rv = rv.reshape(1, -1, 1, 1)
    return g * (x - rm) / jnp.sqrt(rv + eps) + b


# ------------------------------- main --------------------------------------- #
if __name__ == "__main__":
    keys = jax.random.split(jax.random.PRNGKey(0), 6)

    # --- primary small config (B=2, C=4, 16x16) ---
    B, C, H, W = 2, 4, 16, 16
    x = jax.random.normal(keys[0], (B, C, H, W), dtype=jnp.float32)
    gamma = 1.0 + 0.1 * jax.random.normal(keys[1], (2, C), dtype=jnp.float32)
    beta = 0.1 * jax.random.normal(keys[2], (2, C), dtype=jnp.float32)
    running_mean1 = jnp.zeros((C,), dtype=jnp.float32)   # PyTorch default init
    running_var1 = jnp.ones((C,), dtype=jnp.float32)     # PyTorch default init

    y_train = jax.block_until_ready(sync_dsbn_train(x, gamma, beta))
    y_train_ref = _ref_train(x, gamma, beta)
    assert y_train.shape == (B, C, H, W)
    assert jnp.allclose(y_train, y_train_ref, atol=1e-4, rtol=1e-4)

    y_eval = jax.block_until_ready(
        sync_dsbn_eval(x, gamma[0], beta[0], running_mean1, running_var1))
    y_eval_ref = _ref_eval(x, gamma[0], beta[0], running_mean1, running_var1)
    assert y_eval.shape == (B, C, H, W)
    assert jnp.allclose(y_eval, y_eval_ref, atol=1e-4, rtol=1e-4)

    # --- second config exercising the tiled reduction (half=2, hw tiles=2),
    #     with a non-zero mean to stress the variance-merge numerics ---
    B2, C2, H2, W2 = 4, 8, 16, 16
    x2 = 2.0 + jax.random.normal(keys[3], (B2, C2, H2, W2), dtype=jnp.float32)
    gamma2 = 1.0 + 0.1 * jax.random.normal(keys[4], (2, C2), dtype=jnp.float32)
    beta2 = 0.1 * jax.random.normal(keys[5], (2, C2), dtype=jnp.float32)

    y2 = jax.block_until_ready(
        sync_dsbn_train(x2, gamma2, beta2, lane_tile=128))
    y2_ref = _ref_train(x2, gamma2, beta2)
    assert y2.shape == (B2, C2, H2, W2)
    assert jnp.allclose(y2, y2_ref, atol=1e-4, rtol=1e-4)

    print("KERNEL_OK")
</pallas_src>

<mosaic_0001>
module attributes {stable_mosaic.version = 11 : i64} {
  func.func @_stats_kernel(%arg0: i32, %arg1: i32, %arg2: i32, %arg3: memref<1x4x256xf32, #tpu.memory_space<vmem>>, %arg4: memref<1x4x1xf32, #tpu.memory_space<vmem>>, %arg5: memref<1x4x1xf32, #tpu.memory_space<vmem>>, %arg6: memref<4x1xf32, #tpu.memory_space<vmem>>, %arg7: memref<4x1xf32, #tpu.memory_space<vmem>>) attributes {dimension_semantics = [#tpu.dimension_semantics<parallel>, #tpu.dimension_semantics<arbitrary>, #tpu.dimension_semantics<arbitrary>], iteration_bounds = array<i64: 2, 1, 1>, scalar_prefetch = 0 : i64, scratch_operands = 2 : i64, tpu.core_type = #tpu.core_type<tc>, window_params = [{transform_indices = @transform_0, window_bounds = array<i64: 1, 4, 256>}, {transform_indices = @transform_1, window_bounds = array<i64: 1, 4, 1>}, {transform_indices = @transform_2, window_bounds = array<i64: 1, 4, 1>}]} {
    %c0_i32 = arith.constant 0 : i32
    %0 = arith.cmpi eq, %arg1, %c0_i32 : i32
    %c0_i32_0 = arith.constant 0 : i32
    %1 = arith.cmpi eq, %arg2, %c0_i32_0 : i32
    %2 = arith.andi %0, %1 : i1
    %3 = arith.extui %2 : i1 to i32
    %c0_i32_1 = arith.constant 0 : i32
    %4 = arith.cmpi ne, %3, %c0_i32_1 : i32
    scf.if %4 {
      %cst_22 = arith.constant 0.000000e+00 : f32
      %44 = vector.broadcast %cst_22 : f32 to vector<4x1xf32>
      %c0_23 = arith.constant 0 : index
      %c0_24 = arith.constant 0 : index
      %45 = vector.load %arg6[%c0_23, %c0_24] : memref<4x1xf32, #tpu.memory_space<vmem>>, vector<4x1xf32>
      tpu.vector_store %arg6[%c0_23, %c0_24], %44 {strides = array<i32>} : memref<4x1xf32, #tpu.memory_space<vmem>>, vector<4x1xf32>,
      %cst_25 = arith.constant 0.000000e+00 : f32
      %46 = vector.broadcast %cst_25 : f32 to vector<4x1xf32>
      %c0_26 = arith.constant 0 : index
      %c0_27 = arith.constant 0 : index
      %47 = vector.load %arg7[%c0_26, %c0_27] : memref<4x1xf32, #tpu.memory_space<vmem>>, vector<4x1xf32>
      tpu.vector_store %arg7[%c0_26, %c0_27], %46 {strides = array<i32>} : memref<4x1xf32, #tpu.memory_space<vmem>>, vector<4x1xf32>,
    } else {
    }
    %c0 = arith.constant 0 : index
    %c0_2 = arith.constant 0 : index
    %c0_3 = arith.constant 0 : index
    %5 = vector.load %arg3[%c0, %c0_2, %c0_3] : memref<1x4x256xf32, #tpu.memory_space<vmem>>, vector<1x4x256xf32>
    %6 = vector.shape_cast %5 : vector<1x4x256xf32> to vector<4x256xf32>
    %cst = arith.constant dense<0.000000e+00> : vector<4xf32>
    %7 = vector.multi_reduction <add>, %6, %cst [1] : vector<4x256xf32> to vector<4xf32>
    %8 = vector.shape_cast %7 : vector<4xf32> to vector<4x1xf32>
    %cst_4 = arith.constant 3.906250e-03 : f32
    %9 = vector.broadcast %cst_4 : f32 to vector<4x1xf32>
    %10 = arith.mulf %8, %9 : vector<4x1xf32>
    %11 = vector.broadcast %10 : vector<4x1xf32> to vector<4x256xf32>
    %12 = arith.subf %6, %11 : vector<4x256xf32>
    %13 = arith.mulf %12, %12 : vector<4x256xf32>
    %cst_5 = arith.constant dense<0.000000e+00> : vector<4xf32>
    %14 = vector.multi_reduction <add>, %13, %cst_5 [1] : vector<4x256xf32> to vector<4xf32>
    %15 = vector.shape_cast %14 : vector<4xf32> to vector<4x1xf32>
    %c1_i32 = arith.constant 1 : i32
    %16 = arith.muli %arg1, %c1_i32 : i32
    %17 = arith.addi %16, %arg2 : i32
    %18 = vector.broadcast %17 : i32 to vector<4x1xi32>
    %19 = arith.sitofp %18 : vector<4x1xi32> to vector<4x1xf32>
    %cst_6 = arith.constant 1.000000e+00 : f32
    %20 = vector.broadcast %cst_6 : f32 to vector<4x1xf32>
    %21 = arith.addf %19, %20 : vector<4x1xf32>
    %cst_7 = arith.constant 1.000000e+00 : f32
    %22 = vector.broadcast %cst_7 : f32 to vector<4x1xf32>
    %23 = arith.divf %22, %21 : vector<4x1xf32>
    %c0_8 = arith.constant 0 : index
    %c0_9 = arith.constant 0 : index
    %24 = vector.load %arg6[%c0_8, %c0_9] : memref<4x1xf32, #tpu.memory_space<vmem>>, vector<4x1xf32>
    %25 = arith.subf %10, %24 : vector<4x1xf32>
    %c0_10 = arith.constant 0 : index
    %c0_11 = arith.constant 0 : index
    %26 = vector.load %arg6[%c0_10, %c0_11] : memref<4x1xf32, #tpu.memory_space<vmem>>, vector<4x1xf32>
    %27 = arith.mulf %25, %23 : vector<4x1xf32>
    %28 = arith.addf %26, %27 : vector<4x1xf32>
    %c0_12 = arith.constant 0 : index
    %c0_13 = arith.constant 0 : index
    %29 = vector.load %arg6[%c0_12, %c0_13] : memref<4x1xf32, #tpu.memory_space<vmem>>, vector<4x1xf32>
    tpu.vector_store %arg6[%c0_12, %c0_13], %28 {strides = array<i32>} : memref<4x1xf32, #tpu.memory_space<vmem>>, vector<4x1xf32>,
    %c0_14 = arith.constant 0 : index
    %c0_15 = arith.constant 0 : index
    %30 = vector.load %arg7[%c0_14, %c0_15] : memref<4x1xf32, #tpu.memory_space<vmem>>, vector<4x1xf32>
    %31 = arith.addf %30, %15 : vector<4x1xf32>
    %32 = arith.mulf %25, %25 : vector<4x1xf32>
    %cst_16 = arith.constant 2.560000e+02 : f32
    %33 = vector.broadcast %cst_16 : f32 to vector<4x1xf32>
    %34 = arith.mulf %33, %19 : vector<4x1xf32>
    %35 = arith.mulf %34, %23 : vector<4x1xf32>
    %36 = arith.mulf %32, %35 : vector<4x1xf32>
    %37 = arith.addf %31, %36 : vector<4x1xf32>
    %c0_17 = arith.constant 0 : index
    %c0_18 = arith.constant 0 : index
    %38 = vector.load %arg7[%c0_17, %c0_18] : memref<4x1xf32, #tpu.memory_space<vmem>>, vector<4x1xf32>
    tpu.vector_store %arg7[%c0_17, %c0_18], %37 {strides = array<i32>} : memref<4x1xf32, #tpu.memory_space<vmem>>, vector<4x1xf32>,
    %c0_i32_19 = arith.constant 0 : i32
    %39 = arith.cmpi eq, %arg1, %c0_i32_19 : i32
    %c0_i32_20 = arith.constant 0 : i32
    %40 = arith.cmpi eq, %arg2, %c0_i32_20 : i32
    %41 = arith.andi %39, %40 : i1
    %42 = arith.extui %41 : i1 to i32
    %c0_i32_21 = arith.constant 0 : i32
    %43 = arith.cmpi ne, %42, %c0_i32_21 : i32
    scf.if %43 {
      %c0_22 = arith.constant 0 : index
      %c0_23 = arith.constant 0 : index
      %44 = vector.load %arg6[%c0_22, %c0_23] : memref<4x1xf32, #tpu.memory_space<vmem>>, vector<4x1xf32>
      %c0_24 = arith.constant 0 : index
      %c0_25 = arith.constant 0 : index
      %c0_26 = arith.constant 0 : index
      %45 = vector.load %arg4[%c0_24, %c0_25, %c0_26] : memref<1x4x1xf32, #tpu.memory_space<vmem>>, vector<1x4x1xf32>
      %46 = vector.shape_cast %45 : vector<1x4x1xf32> to vector<4x1xf32>
      %47 = vector.shape_cast %44 : vector<4x1xf32> to vector<1x4x1xf32>
      tpu.vector_store %arg4[%c0_24, %c0_25, %c0_26], %47 {strides = array<i32>} : memref<1x4x1xf32, #tpu.memory_space<vmem>>, vector<1x4x1xf32>,
      %c0_27 = arith.constant 0 : index
      %c0_28 = arith.constant 0 : index
      %48 = vector.load %arg7[%c0_27, %c0_28] : memref<4x1xf32, #tpu.memory_space<vmem>>, vector<4x1xf32>
      %cst_29 = arith.constant 3.906250e-03 : f32
      %49 = vector.broadcast %cst_29 : f32 to vector<4x1xf32>
      %50 = arith.mulf %48, %49 : vector<4x1xf32>
      %c0_30 = arith.constant 0 : index
      %c0_31 = arith.constant 0 : index
      %c0_32 = arith.constant 0 : index
      %51 = vector.load %arg5[%c0_30, %c0_31, %c0_32] : memref<1x4x1xf32, #tpu.memory_space<vmem>>, vector<1x4x1xf32>
      %52 = vector.shape_cast %51 : vector<1x4x1xf32> to vector<4x1xf32>
      %53 = vector.shape_cast %50 : vector<4x1xf32> to vector<1x4x1xf32>
      tpu.vector_store %arg5[%c0_30, %c0_31, %c0_32], %53 {strides = array<i32>} : memref<1x4x1xf32, #tpu.memory_space<vmem>>, vector<1x4x1xf32>,
    } else {
    }
    return
  }
  func.func @transform_0(%arg0: i32, %arg1: i32, %arg2: i32) -> (i32, i32, i32) {
    %c1_i32 = arith.constant 1 : i32
    %0 = arith.muli %arg0, %c1_i32 : i32
    %1 = arith.addi %0, %arg1 : i32
    %c0_i32 = arith.constant 0 : i32
    %c0_i32_0 = arith.constant 0 : i32
    return %1, %c0_i32, %arg2 : i32, i32, i32
  }
  func.func @transform_1(%arg0: i32, %arg1: i32, %arg2: i32) -> (i32, i32, i32) {
    %c0_i32 = arith.constant 0 : i32
    %c0_i32_0 = arith.constant 0 : i32
    %c0_i32_1 = arith.constant 0 : i32
    return %arg0, %c0_i32, %c0_i32_0 : i32, i32, i32
  }
  func.func @transform_2(%arg0: i32, %arg1: i32, %arg2: i32) -> (i32, i32, i32) {
    %c0_i32 = arith.constant 0 : i32
    %c0_i32_0 = arith.constant 0 : i32
    %c0_i32_1 = arith.constant 0 : i32
    return %arg0, %c0_i32, %c0_i32_0 : i32, i32, i32
  }
}

</mosaic_0001>

<bundles_post_ra>
// kernel: tpu_custom_call.1
= control target key start
LH: loop header
LB: loop body
LE: loop exit
PB: predicated region body
PF: predicated region fallthrough
CT: control target
= control target key end

     0   :  { %8 = vsyncpa [#allocation5], 0  ;;  %s669_s0 = inlined_call_operand.hbm [shape: f32[2,4,256], index: 0, kind: input, shape index: {}]   ;;  %s670_s1 = inlined_call_operand.vmem [shape: f32[2,4,1], index: 1, kind: output, shape index: {0}]   ;;  %s671_s2 = inlined_call_operand.vmem [shape: f32[2,4,1], index: 2, kind: output, shape index: {1}]  }
   0x1   :  { %10 = vsyncpa [#allocation5 + $0x1], 0  ;;  %s568_s9 = smov 0   ;;  %s570_s10 = smov 0  }
   0x2   :  { %s572_s11 = smov 0   ;;  %s574_s12 = smov 0  }
   0x3   :  { %s576_s13 = smov 0   ;;  %s578_s14 = smov 0  }
   0x4 LB: > { %s394_s15 = sadd.s32 4294967295, %s548_s14   ;;  %s35_s16 = sadd.s32 1, %s544_s13  ;;  %s548_s14 = sphi %s578_s14, %s16_s14   ;;  %s544_s13 = sphi %s576_s13, %s678_s13   ;;  %s540_s12 = sphi %s574_s12, %s677_s12   ;;  %s536_s11 = sphi %s572_s11, %s676_s11   ;;  %s532_s10 = sphi %s570_s10, %s675_s10   ;;  %s528_s9 = sphi %s568_s9, %s674_s9  }
   0x5   : > { %p37_p0 = scmp.ge.s32.totalorder %s35_s16, 2  ;;  %s46_s17 = sadd.s32 1, %s536_s11 }
   0x6   : > { %p53_p1 = scmp.ne.s32.totalorder %s536_s11, %s532_s10  ;;  %p54_p2 = scmp.eq.s32.totalorder %s548_s14, 0 }
   0x7   : > { %s680_s16 = smov (%p37_p0, %s35_s16), 0  ;;  %p59_p4 = scmp.ne.s32.totalorder %s532_s10, %s528_s9 }
   0x8   : > { %p604_p3 = por %p54_p2, %p53_p1  ;;  %s41_s19 = ssub.s32 %s544_s13, %s680_s16 }
   0x9   : > { %p60_p5 = scmp.eq.s32.totalorder %s394_s15, 0  ;;  %p44_p6 = scmp.eq.s32.totalorder %s41_s19, 0 }
   0xa   : > { %p414_p8 = scmp.lt.s32.totalorder %s548_s14, 2  ;;  %s135_s22 = sand.u32 1, %s536_s11  }
   0xb   : > { %p611_p7 = por %p60_p5, %p59_p4  ;;  %s407_s23 = sshll.u32 %s544_s13, 3 }
   0xc   : > { %s617_s21 = scalar_select %p44_p6, %s536_s11, %s46_s17  }
   0xd   : > { %s398_s24 = sshll.u32 %s135_s22, 3  ;;  %s147_s27 = scalar_lea.hbm %s669_s0, %s407_s23 }
   0xe   : > { %s149_s28 = sshll.u32 %s147_s27, 4  ;;  %s139_s29 = scalar_lea.vmem [#allocation4], %s398_s24  ;;  %s150_s28 = int_to_ptr.hbm [resolvable:$true] %s149_s28 }
   0xf   : > { %s151_s30 = sshll.u32 %s139_s29, 4  ;;  %p411_p9 = pnand %p414_p8, %p604_p3  ;;  %s152_s30 = int_to_ptr.vmem [resolvable:$true] %s151_s30 }
  0x10   : > { %p401_p10 = scmp.ge.s32.totalorder %s548_s14, 1  ;;  %p156_p11 = scmp.lt.s32.totalorder %s548_s14, 3 }
  0x11   : > { %s136_s3 = scalar_lea.sflag [#allocation5], %s135_s22 }
  0x12   : > { %413 = dma.hbm_to_vmem [thread:$0]  (!%p411_p9), %s150_s28, 128, %s152_s30, %s136_s3  }
  0x13   : > { %p157_p12 = pnand %p401_p10, %p156_p11 }
  0x14   : > { %s162_s4 = sand.u32 (!%p157_p12), 1, %s532_s10  }
  0x15   : > { %160 = sbr.rel (%p157_p12) target bundleno = 307 (0x133), region = 24  ;;  %s402_s5 = sshll.u32 (!%p157_p12), %s162_s4, 3 }
  0x16   : > { %s163_s6 = scalar_lea.sflag (!%p157_p12), [#allocation5], %s162_s4  ;;  %s166_s7 = scalar_lea.vmem (!%p157_p12), [#allocation4], %s402_s5 }
  0x1a   : > { %523 = dma.done.wait (%p611_p7), %s163_s6, 128  }
  0x1b   : > { %525 = vsyncadd (%p611_p7), %s163_s6, 4294967168  ;;  %vm207_vm0 = vcmask 3072   ;;  %v550_v0 = vmov 0.0   ;;  %v210_v1 = vld [vmem:[%s166_s7] sm:$0xff]  ;;  %vm217_vm1 = vcmask 1043456   ;;  %v551_v7 = vmov 1.0  }
  0x1c   : > { %208 = vst.msk [vmem:[#allocation2] sm:$0xf] %vm207_vm0, %v550_v0  ;;  %466 = vrcp.f32 %v551_v7  ;;  %v552_v11 = vmov 839922192   ;;  %p193_p13 = scmp.lt.s32.totalorder %s540_s12, 1 }
  0x1d   : > { %209 = vst.msk [vmem:[#allocation3] sm:$0xf] %vm207_vm0, %v550_v0  ;;  %v226_v12 = vunpack.c.l.s4 %v552_v11 }
  0x1e   : > { %212 = vst [vmem:[#allocation1] ss:$2 sm:$0xff] %v210_v1  ;;  %s682_s12 = smov (!%p193_p13, %s540_s12), 1 }
  0x1f   : > { %v227_v14 = vunpack.c.0.s8 %v226_v12  ;;  %s403_s8 = sshll.u32 %s682_s12, 2 }
  0x20   : > { %s196_s17 = scalar_lea.vmem %s670_s1, %s403_s8  ;;  %s200_s19 = scalar_lea.vmem %s671_s2, %s403_s8 }
  0x22   : > { %v467_v8 = vpop.eup %466 }
  0x23   : > { %v249_v9 = vsub.f32 1.0, %v467_v8  ;;  %vm253_vm2 = vweird.f32 %v467_v8  ;;  %v262_v17 = vld [vmem:[#allocation2] sm:$0xf] }
  0x24   : > { %v268_v34 = vld [vmem:[#allocation3] sm:$0xf] }
  0x25   : > { %v213_v2 = vld.sshfl [vmem:[#allocation1] sm:$0xff pattern:$0x75316420]  ;;  %v214_v3 = vld.sshfl [vmem:[#allocation1 + $0x8] sm:$0xff pattern:$0x75316420]  ;;  %v250_v10 = vmul.f32 %v467_v8, %v249_v9 }
  0x26   : > { %v218_v4 = vsel %vm217_vm1, %v213_v2, 0.0  ;;  %v219_v5 = vsel %vm217_vm1, %v214_v3, 0.0 }
  0x27   : > { %v220_v6 = vadd.f32 %v219_v5, %v218_v4  ;;  %v251_v13 = vadd.f32 %v467_v8, %v250_v10 }
  0x29   : > { %221 = vadd.xlane.f32.xlu0 %v220_v6  ;;  %v255_v15 = vsel %vm253_vm2, %v467_v8, %v251_v13 }
  0x2a   : > { %v272_v21 = vmul.f32 0.0, %v255_v15 }
  0x9c   : > { %v222_v16 = vpop.xlane.xlu0 %221 }
  0x9d   : > { %v223_v18 = vmul.f32 0.00390625, %v222_v16 }
  0x9f   : > { %v228_v19 = vperm.slane %v223_v18, %v227_v14  ;;  %v263_v20 = vsub.f32 %v223_v18, %v262_v17 }
  0xa1   : > { %v230_v22 = vsub.f32 %v210_v1, %v228_v19  ;;  %v264_v23 = vmul.f32 %v263_v20, %v255_v15  ;;  %v270_v24 = vmul.f32 %v263_v20, %v263_v20 }
  0xa3   : > { %v231_v25 = vmul.f32 %v230_v22, %v230_v22  ;;  %v265_v26 = vadd.f32 %v264_v23, %v262_v17  ;;  %v273_v27 = vmul.f32 %v272_v21, %v270_v24 }
  0xa5   : > { %233 = vst [vmem:[#allocation1] ss:$2 sm:$0xff] %v231_v25 }
  0xa6   : > { %267 = vst.msk [vmem:[#allocation2] sm:$0xf] %vm207_vm0, %v265_v26 }
  0xac   : > { %v234_v28 = vld.sshfl [vmem:[#allocation1] sm:$0xff pattern:$0x75316420]  ;;  %v235_v29 = vld.sshfl [vmem:[#allocation1 + $0x8] sm:$0xff pattern:$0x75316420] }
  0xad   : > { %v278_v30 = vld [vmem:[#allocation2] sm:$0xf]  ;;  %v238_v31 = vsel %vm217_vm1, %v234_v28, 0.0  ;;  %v239_v32 = vsel %vm217_vm1, %v235_v29, 0.0 }
  0xae   : > { %279 = vst.msk [vmem:[%s196_s17] sm:$0xf] %vm207_vm0, %v278_v30  ;;  %v240_v33 = vadd.f32 %v239_v32, %v238_v31 }
  0xb0   : > { %241 = vadd.xlane.f32.xlu0 %v240_v33 }
 0x123   : > { %v242_v35 = vpop.xlane.xlu0 %241 }
 0x124   : > { %v269_v36 = vadd.f32 %v268_v34, %v242_v35 }
 0x126   : > { %v274_v37 = vadd.f32 %v273_v27, %v269_v36 }
 0x128   : > { %275 = vst.msk [vmem:[#allocation3] sm:$0xf] %vm207_vm0, %v274_v37 }
 0x12f   : > { %v280_v38 = vld [vmem:[#allocation3] sm:$0xf] }
 0x130   : > { %v281_v39 = vmul.f32 0.00390625, %v280_v38 }
 0x132   : > { %282 = vst.msk [vmem:[%s200_s19] sm:$0xf] %vm207_vm0, %v281_v39 }
 0x133 PF: > { %s16_s14 = sadd.s32 1, %s548_s14   ;;  %s674_s9 = smov %s532_s10 }
 0x134   : > { %p13_p0 = scmp.ge.s32.totalorder %s16_s14, 4   ;;  %s675_s10 = smov %s536_s11 }
 0x135   : > { %s676_s11 = smov %s617_s21  ;;  %s677_s12 = smov %s544_s13 }
 0x136   : > { %s678_s13 = smov %s680_s16  ;;  %15 = sbr.rel (!%p13_p0) target bundleno = 4 (0x4), region = 84 }
 0x13b   :  { %316 = vsyncpa [#allocation5], 1 }
 0x13c   :  { %318 = vsyncpa [#allocation5 + $0x1], 1 }

</bundles_post_ra>
